<compile_context>
chip_gen: v5e
topology: v5e:2x2
jax: 0.10.0
libtpu: 0.0.40
codegen_flags: <defaults>
</compile_context>

<pallas_src>
import functools

import jax
import jax.numpy as jnp
import numpy as np
from jax.experimental import pallas as pl
from jax.experimental.pallas import tpu as pltpu


# 3x3 taps in (dh, dw) order; tap index t = (dh+1)*3 + (dw+1) = kh*3 + kw.
_TAPS = tuple((dh, dw) for dh in (-1, 0, 1) for dw in (-1, 0, 1))


@functools.lru_cache(maxsize=None)
def _roll_matches_jnp_roll():
    """One-off probe of pltpu.roll's shift convention on this backend.

    Returns True if pltpu.roll(x, s, axis) behaves like jnp.roll
    (result[i] = x[(i - s) % n]).  The wrap-around lanes are masked in the
    main kernel either way, but the shift sign must match the convention.
    """
    def probe(x_ref, o_ref):
        o_ref[...] = pltpu.roll(x_ref[...], shift=1, axis=1)

    x = jax.lax.broadcasted_iota(jnp.float32, (8, 128), 1)
    out = pl.pallas_call(
        probe, out_shape=jax.ShapeDtypeStruct((8, 128), jnp.float32))(x)
    return bool(np.asarray(out)[0, 0] == 127.0)


def _convcaps_kernel(x_ref, wf_ref, b_ref, o_ref, col_ref, *,
                     height, width, num_capsule, input_ch, batch_block,
                     roll_like_jnp):
    # x_ref  : (BB*IC*D, HW)   rows ordered (b, ic, d); lanes = flat pixels
    # wf_ref : (N*D, 9*D)      fused depthwise(3x3)+pointwise(1x1) weight
    # b_ref  : (N*D, 1)        fused bias
    # o_ref  : (BB*N*IC, D, HW) rows ordered (b, n, ic)
    # col_ref: (9*D, BB*IC*HW) VMEM im2col scratch; lanes ordered (b, ic, pixel)
    H, W = height, width
    HW = H * W
    N, IC, BB = num_capsule, input_ch, batch_block
    D = wf_ref.shape[1] // 9
    G = BB * IC                       # images folded into the matmul lane axis

    wf = wf_ref[...]                  # (N*D, 9*D)
    bias = b_ref[...]                 # (N*D, 1)
    x2 = x_ref[...]                   # (G*D, HW)

    # Hoisted boundary masks (lane-only, broadcast across all rows).
    pos = jax.lax.broadcasted_iota(jnp.int32, (1, HW), 1)
    w_idx = pos % W
    h_idx = pos // W
    ok_h = {-1: h_idx > 0, 1: h_idx < H - 1}
    ok_w = {-1: w_idx > 0, 1: w_idx < W - 1}

    # Build the fused im2col block directly in VMEM scratch:
    #   col_ref[t*D + d, g*HW + p] = x[g, d, p + dh*W + dw]  (0 outside image)
    for t, (dh, dw) in enumerate(_TAPS):
        off = dh * W + dw
        if off == 0:
            v = x2
        else:
            shift = (-off) % HW if roll_like_jnp else off % HW
            v = pltpu.roll(x2, shift=shift, axis=1)      # XLU lane rotate
        m = ok_h.get(dh)
        if dw != 0:
            m = ok_w[dw] if m is None else jnp.logical_and(m, ok_w[dw])
        if m is not None:
            v = jnp.where(m, v, 0.0)                     # kill wrap-around
        for g in range(G):
            col_ref[pl.ds(t * D, D), pl.ds(g * HW, HW)] = v[g * D:(g + 1) * D, :]

    # One wide MXU matmul per batch element: (N*D, 9*D) @ (9*D, IC*HW).
    ICHW = IC * HW
    for b in range(BB):
        col = col_ref[:, b * ICHW:(b + 1) * ICHW]
        acc = jnp.dot(wf, col, preferred_element_type=jnp.float32) + bias
        for n in range(N):
            for ic in range(IC):
                o_ref[(b * N + n) * IC + ic] = acc[
                    n * D:(n + 1) * D, ic * HW:(ic + 1) * HW].astype(o_ref.dtype)


def convcaps_forward(x, dw_w, dw_b, pw_w, pw_b, num_capsule, *, batch_block=None):
    """ConvCaps.forward (stride=1 path).  x: (B, IC, D, H, W) float32.

    Returns (B, N, IC, D, H, W) float32.
    """
    B, IC, D, H, W = x.shape
    N = num_capsule
    ND = N * D
    HW = H * W

    # Single grid step by default: best on single-TensorCore chips (v5e/v6e).
    # On v7x pass batch_block=1 so the two batch elements split across the
    # two TensorCores ("parallel" batch axis).
    if batch_block is None:
        batch_block = B
    assert B % batch_block == 0
    BB = batch_block

    # Free contiguous reshape -- no HBM layout pass before the kernel.
    x_k = x.astype(jnp.float32).reshape(B * IC * D, HW)

    # Fuse depthwise 3x3 (groups=D) into the pointwise 1x1 (exact in f32):
    #   Wf[nd, t*D + d] = pw[nd, d] * dw[d, kh, kw],  t = kh*3 + kw
    #   b'[nd]          = pw_b[nd] + sum_d pw[nd, d] * dw_b[d]
    pw = pw_w[:, :, 0, 0].astype(jnp.float32)                             # (ND, D)
    dw9 = jnp.transpose(dw_w[:, 0].astype(jnp.float32), (1, 2, 0)).reshape(9, D)
    wf = (pw[:, None, :] * dw9[None, :, :]).reshape(ND, 9 * D)
    bf = (pw_b.astype(jnp.float32)
          + jnp.sum(pw * dw_b.astype(jnp.float32)[None, :], axis=1)).reshape(ND, 1)

    kernel = functools.partial(
        _convcaps_kernel, height=H, width=W, num_capsule=N, input_ch=IC,
        batch_block=BB, roll_like_jnp=_roll_matches_jnp_roll())

    out = pl.pallas_call(
        kernel,
        out_shape=jax.ShapeDtypeStruct((B * N * IC, D, HW), jnp.float32),
        grid=(B // BB,),
        in_specs=[
            pl.BlockSpec((BB * IC * D, HW), lambda b: (b, 0)),
            pl.BlockSpec((ND, 9 * D), lambda b: (0, 0)),
            pl.BlockSpec((ND, 1), lambda b: (0, 0)),
        ],
        out_specs=pl.BlockSpec((BB * N * IC, D, HW), lambda b: (b, 0, 0)),
        scratch_shapes=[pltpu.VMEM((9 * D, BB * IC * HW), jnp.float32)],
        compiler_params=pltpu.CompilerParams(
            dimension_semantics=("parallel",)),
    )(x_k, wf, bf)

    # Free contiguous reshape back to the module's (B, N, IC, D, H, W) layout.
    return out.reshape(B, N, IC, D, H, W)


def reference_forward_np(x, dw_w, dw_b, pw_w, pw_b, num_capsule):
    """float64 NumPy reference mirroring the PyTorch forward (stride=1)."""
    x = np.asarray(x, np.float64)
    dw_w = np.asarray(dw_w, np.float64)
    dw_b = np.asarray(dw_b, np.float64)
    pw_w = np.asarray(pw_w, np.float64)
    pw_b = np.asarray(pw_b, np.float64)
    B, IC, D, H, W = x.shape
    N = num_capsule

    xp = np.pad(x, ((0, 0), (0, 0), (0, 0), (1, 1), (1, 1)))
    dw = np.zeros((B, IC, D, H, W), np.float64)
    for kh in range(3):
        for kw in range(3):
            dw += (dw_w[None, None, :, 0, kh, kw, None, None]
                   * xp[:, :, :, kh:kh + H, kw:kw + W])
    dw += dw_b[None, None, :, None, None]

    pw = pw_w[:, :, 0, 0]                                  # (N*D, D)
    out = np.einsum("od,bidhw->biohw", pw, dw) + pw_b[None, None, :, None, None]
    out = out.reshape(B, IC, N, D, H, W).transpose(0, 2, 1, 3, 4, 5)
    return out                                             # (B, N, IC, D, H, W)


if __name__ == "__main__":
    # Small shapes consistent with the module: input_shape = (B, IC, D, H, W).
    B, IC, D, H, W = 2, 4, 8, 16, 16      # input_ch=4, dim_capsule=8
    N = 4                                  # n_channels (num_capsule)

    key = jax.random.PRNGKey(0)
    kx, k1, k2, k3, k4 = jax.random.split(key, 5)

    x = jax.random.normal(kx, (B, IC, D, H, W), dtype=jnp.float32)
    # Deterministic synthetic parameters (torch Conv2d weight layouts).
    dw_w = jax.random.normal(k1, (D, 1, 3, 3), dtype=jnp.float32) * 0.2
    dw_b = jax.random.normal(k2, (D,), dtype=jnp.float32) * 0.1
    pw_w = jax.random.normal(k3, (N * D, D, 1, 1), dtype=jnp.float32) * 0.2
    pw_b = jax.random.normal(k4, (N * D,), dtype=jnp.float32) * 0.1
    # Note: the module's Att_W parameter is initialized but unused in forward().

    out = jax.block_until_ready(convcaps_forward(x, dw_w, dw_b, pw_w, pw_b, N))
    assert out.shape == (B, N, IC, D, H, W), out.shape

    ref = reference_forward_np(np.asarray(x), np.asarray(dw_w), np.asarray(dw_b),
                               np.asarray(pw_w), np.asarray(pw_b), N)
    np.testing.assert_allclose(np.asarray(out), ref, rtol=2e-3, atol=2e-3)
    print("KERNEL_OK")
</pallas_src>

<mosaic_0001>
module attributes {stable_mosaic.version = 11 : i64} {
  func.func @probe(%arg0: memref<8x128xf32, #tpu.memory_space<vmem>>, %arg1: memref<8x128xf32, #tpu.memory_space<vmem>>) attributes {dimension_semantics = [], scalar_prefetch = 0 : i64, scratch_operands = 0 : i64, tpu.core_type = #tpu.core_type<tc>} {
    %c0 = arith.constant 0 : index
    %c0_0 = arith.constant 0 : index
    %0 = vector.load %arg0[%c0, %c0_0] : memref<8x128xf32, #tpu.memory_space<vmem>>, vector<8x128xf32>
    %c1_i32 = arith.constant 1 : i32
    %1 = tpu.dynamic_rotate %0 by %c1_i32 dim 1 : vector<8x128xf32>, i32 -> vector<8x128xf32>
    %c0_1 = arith.constant 0 : index
    %c0_2 = arith.constant 0 : index
    %2 = vector.load %arg1[%c0_1, %c0_2] : memref<8x128xf32, #tpu.memory_space<vmem>>, vector<8x128xf32>
    tpu.vector_store %arg1[%c0_1, %c0_2], %1 {strides = array<i32>} : memref<8x128xf32, #tpu.memory_space<vmem>>, vector<8x128xf32>,
    return
  }
}

</mosaic_0001>

<bundles_post_ra>
// kernel: tpu_custom_call.1
= control target key start
LH: loop header
LB: loop body
LE: loop exit
PB: predicated region body
PF: predicated region fallthrough
CT: control target
= control target key end

     0   :  { %6 = vsyncpa [#allocation3], 0  ;;  %s118_s0 = inlined_call_operand.hbm [shape: f32[8,128], index: 0, kind: input, shape index: {}]   ;;  %s119_s1 = inlined_call_operand.hbm [shape: f32[8,128], index: 1, kind: output, shape index: {}]  }
   0x1   :  { %7 = vsyncpa [#allocation4], 0  ;;  %s13_s8 = sshll.u32 %s118_s0, 4  ;;  %s99_s9 = smov [#allocation2]   ;;  %s14_s8 = int_to_ptr.hbm [resolvable:$true] %s13_s8 }
   0x2   :  { %s15_s10 = sshll.u32 %s99_s9, 4  ;;  %s16_s10 = int_to_ptr.vmem [resolvable:$true] %s15_s10 }
   0x3   :  { %18 = dma.hbm_to_vmem [thread:$0]  %s14_s8, 128, %s16_s10, [#allocation3]  }
   0x4   :  { %95 = dma.done.wait [#allocation3], 128  }
   0x5   :  { %96 = vsyncadd [#allocation3], 4294967168  ;;  %v23_v0 = vld [vmem:[#allocation2] sm:$0xff]  ;;  %s100_s11 = smov 1   ;;  %s101_s12 = smov [#allocation5]  }
   0x6   :  { %24 = vrot.lane.b32.xlu0 %v23_v0, %s100_s11  ;;  %s32_s13 = sshll.u32 %s101_s12, 4  ;;  %s34_s16 = sshll.u32 %s119_s1, 4  ;;  %s33_s13 = int_to_ptr.vmem [resolvable:$true] %s32_s13  ;;  %s35_s16 = int_to_ptr.hbm [resolvable:$true] %s34_s16 }
  0x78   :  { %v25_v1 = vpop.permute.xlu0 %24 }
  0x79   :  { %26 = vst [vmem:[#allocation5] sm:$0xff] %v25_v1 }
  0x7a   :  { %37 = dma.vmem_to_hbm [thread:$0]  %s33_s13, 128, %s35_s16, [#allocation4]  }
  0x7b   :  { %97 = dma.done.wait [#allocation4], 128  }
  0x7c   :  { %98 = vsyncadd [#allocation4], 4294967168 }
  0x7d   :  { %42 = vsyncpa [#allocation3], 1 }
  0x7e   :  { %43 = vsyncpa [#allocation4], 1 }

</bundles_post_ra>
